<compile_context>
chip_gen: v7x
topology: tpu7x:2x2x1
jax: 0.10.0
libtpu: 0.0.40
codegen_flags: <defaults>
</compile_context>

<pallas_src>
import functools

import jax
import jax.numpy as jnp
from jax.experimental import pallas as pl
from jax.experimental.pallas import tpu as pltpu

COMPUTE_DTYPE = jnp.bfloat16   # matmul operand dtype; accumulation stays f32


def _elu(x):
    # nn.ELU(alpha=1.0)
    return jnp.where(x > 0, x, jnp.expm1(x))


# ----------------------------------------------------------------------------
# Kernel 1: sequence projection + GVP LayerNorm + GVP scalar head + roll/concat
#           + positional encoding.  One grid step per batch element.
# ----------------------------------------------------------------------------
def encode_kernel(xs_ref, s_ref, v_ref, pe_ref,
                  w_seq_ref, b_seq_ref, ln_g_ref, ln_b_ref,
                  wh_ref, ws_ref, bs_ref, o_ref):
    cdt = COMPUTE_DTYPE

    xs = xs_ref[0]                                            # (L, c_in)
    x_seq = jnp.dot(xs.astype(cdt), w_seq_ref[...],
                    preferred_element_type=jnp.float32) + b_seq_ref[...]

    # --- gvp.LayerNorm scalar part ---
    s = s_ref[0]                                              # (L, si)
    mu = jnp.mean(s, axis=-1, keepdims=True)
    var = jnp.mean((s - mu) ** 2, axis=-1, keepdims=True)
    s_ln = (s - mu) * jax.lax.rsqrt(var + 1e-5) * ln_g_ref[...] + ln_b_ref[...]

    # --- gvp.LayerNorm vector part + GVP((si, vi)->(E, 0)) ---
    # v_ref holds the three vector planes stacked on the row axis: [x; y; z]
    v_st = v_ref[0]                                           # (3L, vi)
    L = s.shape[0]
    # one stacked matmul for all three planes (wh has no bias)
    h_st = jnp.dot(v_st.astype(cdt), wh_ref[...],
                   preferred_element_type=jnp.float32)        # (3L, vi)
    vx, vy, vz = v_st[:L], v_st[L:2 * L], v_st[2 * L:]
    hx, hy, hz = h_st[:L], h_st[L:2 * L], h_st[2 * L:]
    vn2 = jnp.maximum(vx * vx + vy * vy + vz * vz, 1e-8)      # per-channel ||v||^2
    inv2 = 1.0 / jnp.mean(vn2, axis=-1, keepdims=True)        # 1 / vn^2 (per pos)
    # ||wh(v/vn)||  ==  sqrt(clamp(inv2 * ||wh(v)||^2, 1e-8))   (scale commutes)
    vhn = jnp.sqrt(jnp.maximum(inv2 * (hx * hx + hy * hy + hz * hz), 1e-8))

    sv = jnp.concatenate([s_ln, vhn], axis=-1)                # (L, si + vi)
    x_str = jnp.dot(sv.astype(cdt), ws_ref[...],
                    preferred_element_type=jnp.float32) + bs_ref[...]   # (L, E)

    # torch.roll(x_str, shifts=2, dims=1): out[i] = in[(i-2) % L]   (XLU roll)
    x_str_rolled = pltpu.roll(x_str, shift=2, axis=0)

    o_ref[0] = jnp.concatenate([x_seq, x_str_rolled], axis=-1) + pe_ref[0]


# ----------------------------------------------------------------------------
# Kernel 2: ALL adapter blocks fused.  grid = (B, num_blocks); the running
#           activation stays in VMEM scratch across the block axis.
#           MultiheadAttention (fused QKV, head-batched) + bottleneck + residual.
# ----------------------------------------------------------------------------
def attn_blocks_kernel(x_ref, mask_ref,
                       wqkv_ref, bqkv_ref, wo_ref, bo_ref,
                       w1_ref, b1_ref, w2_ref, b2_ref,
                       w3_ref, b3_ref, w4_ref, b4_ref,
                       o_ref, x_vmem, *, num_heads):
    cdt = COMPUTE_DTYPE
    blk = pl.program_id(1)

    @pl.when(blk == 0)
    def _():
        x_vmem[...] = x_ref[0]

    x = x_vmem[...]                                           # (L, D2) f32
    L, D2 = x.shape
    H = num_heads
    dh = D2 // H
    scale = float(dh) ** -0.5

    # fused QKV projection: one wide MXU op
    qkv = jnp.dot(x.astype(cdt), wqkv_ref[0],
                  preferred_element_type=jnp.float32) + bqkv_ref[0]     # (L, 3*D2)
    q = qkv[:, :D2] * scale
    k = qkv[:, D2:2 * D2]
    v = qkv[:, 2 * D2:]

    # (L, D2) -> (H, L, dh): head-batched layout
    q3 = jnp.transpose(q.reshape(L, H, dh), (1, 0, 2)).astype(cdt)
    k3 = jnp.transpose(k.reshape(L, H, dh), (1, 0, 2)).astype(cdt)
    v3 = jnp.transpose(v.reshape(L, H, dh), (1, 0, 2)).astype(cdt)

    # key_padding_mask: nonzero => padded key, masked out for every query
    key_bias = jnp.where(mask_ref[0] != 0, -1e30, 0.0)        # (1, L)

    scores = jnp.einsum('hqd,hkd->hqk', q3, k3,
                        preferred_element_type=jnp.float32)   # (H, L, L)
    scores = scores + key_bias[None]
    scores = scores - jnp.max(scores, axis=-1, keepdims=True)
    p = jnp.exp(scores)
    p = p * pl.reciprocal(jnp.sum(p, axis=-1, keepdims=True), approx=True)

    ctx = jnp.einsum('hqk,hkd->hqd', p.astype(cdt), v3,
                     preferred_element_type=jnp.float32)      # (H, L, dh)
    ctx = jnp.transpose(ctx, (1, 0, 2)).reshape(L, D2)

    attn = jnp.dot(ctx.astype(cdt), wo_ref[0],
                   preferred_element_type=jnp.float32) + bo_ref[0]

    # shared bottleneck MLP (dropouts are identity at inference)
    h1 = _elu(jnp.dot(attn.astype(cdt), w1_ref[...],
                      preferred_element_type=jnp.float32) + b1_ref[...])
    h2 = _elu(jnp.dot(h1.astype(cdt), w2_ref[...],
                      preferred_element_type=jnp.float32) + b2_ref[...])
    h3 = _elu(jnp.dot(h2.astype(cdt), w3_ref[...],
                      preferred_element_type=jnp.float32) + b3_ref[...])
    h4 = jnp.dot(h3.astype(cdt), w4_ref[...],
                 preferred_element_type=jnp.float32) + b4_ref[...]

    y = h4 + x                                                # residual
    x_vmem[...] = y                                           # feeds next block

    @pl.when(blk == pl.num_programs(1) - 1)
    def _():
        o_ref[0] = y


# ----------------------------------------------------------------------------
# Kernel 3: final linear projection (row-tiled, lane-dense padded output).
# ----------------------------------------------------------------------------
def linear_kernel(x_ref, w_ref, b_ref, o_ref):
    o_ref[...] = jnp.dot(x_ref[...].astype(COMPUTE_DTYPE), w_ref[...],
                         preferred_element_type=jnp.float32) + b_ref[...]


# ----------------------------------------------------------------------------
# BlockSpec helpers
# ----------------------------------------------------------------------------
def _seq_spec1(shape):   # grid=(B,), batch-indexed
    nd = len(shape)
    return pl.BlockSpec((1,) + tuple(shape[1:]),
                        lambda b, nd=nd: (b,) + (0,) * (nd - 1))


def _full_spec1(shape):  # grid=(B,), replicated
    nd = len(shape)
    return pl.BlockSpec(tuple(shape), lambda b, nd=nd: (0,) * nd)


def _seq_spec2(shape):   # grid=(B, nb), batch-indexed
    nd = len(shape)
    return pl.BlockSpec((1,) + tuple(shape[1:]),
                        lambda b, blk, nd=nd: (b,) + (0,) * (nd - 1))


def _blk_spec2(shape):   # grid=(B, nb), block-indexed (stacked per-block weights)
    nd = len(shape)
    return pl.BlockSpec((1,) + tuple(shape[1:]),
                        lambda b, blk, nd=nd: (blk,) + (0,) * (nd - 1))


def _full_spec2(shape):  # grid=(B, nb), replicated (shared weights, DMA'd once)
    nd = len(shape)
    return pl.BlockSpec(tuple(shape), lambda b, blk, nd=nd: (0,) * nd)


def _round_up(x, m):
    return (x + m - 1) // m * m


# ----------------------------------------------------------------------------
# Wrapper implementing RNAInverseFoldingAdapter.forward
# ----------------------------------------------------------------------------
def rna_inverse_folding_adapter_forward(data, params, *, num_heads, num_blocks):
    lm = data['lm_representation']              # (B, L, c_in)
    s = data['structure_encoding']              # (B, L, si)
    v = data['structure_encoding_vector']       # (B, L, vi, 3)
    pe = data['positional_encoding']            # (B, L, 2E)
    pad = data['pad_mask']                      # (B, L) bool, True = padded

    B, L, _ = lm.shape
    vi = v.shape[2]
    E = params['w_seq'].shape[1]
    D2 = 2 * E
    assert D2 % num_heads == 0
    cdt = COMPUTE_DTYPE

    # layout glue: stack vector x/y/z planes along rows -> (B, 3L, vi)
    v_stack = jnp.transpose(v, (0, 3, 1, 2)).reshape(B, 3 * L, vi)
    mask = pad.astype(jnp.int32).reshape(B, 1, L)

    # ---- encode: linear_in_seq + linear_in_str + roll/concat + pos enc ----
    enc_weights = (params['w_seq'].astype(cdt), params['b_seq'],
                   params['ln_g'], params['ln_b'],
                   params['wh'].astype(cdt), params['ws'].astype(cdt),
                   params['bs'])
    enc_args = (lm, s, v_stack, pe) + enc_weights
    enc_specs = [_seq_spec1(a.shape) for a in enc_args[:4]] + \
                [_full_spec1(a.shape) for a in enc_args[4:]]
    x_seq_input = pl.pallas_call(
        encode_kernel,
        out_shape=jax.ShapeDtypeStruct((B, L, D2), jnp.float32),
        grid=(B,),
        in_specs=enc_specs,
        out_specs=_seq_spec1((B, L, D2)),
        compiler_params=pltpu.CompilerParams(dimension_semantics=("parallel",)),
    )(*enc_args)

    # ---- fused attention blocks: grid = (B, num_blocks) ----
    wqkv = jnp.stack([jnp.concatenate([m['wq'], m['wk'], m['wv']], axis=1)
                      for m in params['mha']], axis=0).astype(cdt)   # (nb, D2, 3D2)
    bqkv = jnp.stack([jnp.concatenate([m['bq'], m['bk'], m['bv']], axis=1)
                      for m in params['mha']], axis=0)               # (nb, 1, 3D2)
    wo_s = jnp.stack([m['wo'] for m in params['mha']], axis=0).astype(cdt)
    bo_s = jnp.stack([m['bo'] for m in params['mha']], axis=0)

    shared = (params['w1'].astype(cdt), params['b1'],
              params['w2'].astype(cdt), params['b2'],
              params['w3'].astype(cdt), params['b3'],
              params['w4'].astype(cdt), params['b4'])

    attn_args = (x_seq_input, mask, wqkv, bqkv, wo_s, bo_s) + shared
    attn_specs = [_seq_spec2(x_seq_input.shape), _seq_spec2(mask.shape),
                  _blk_spec2(wqkv.shape), _blk_spec2(bqkv.shape),
                  _blk_spec2(wo_s.shape), _blk_spec2(bo_s.shape)] + \
                 [_full_spec2(w.shape) for w in shared]

    x_seq_input = pl.pallas_call(
        functools.partial(attn_blocks_kernel, num_heads=num_heads),
        out_shape=jax.ShapeDtypeStruct((B, L, D2), jnp.float32),
        grid=(B, num_blocks),
        in_specs=attn_specs,
        out_specs=_seq_spec2((B, L, D2)),
        scratch_shapes=[pltpu.VMEM((L, D2), jnp.float32)],
        compiler_params=pltpu.CompilerParams(
            dimension_semantics=("parallel", "arbitrary"),
            vmem_limit_bytes=32 * 1024 * 1024),
    )(*attn_args)

    # ---- linear_out: row-tiled, output lane-padded 5 -> 128 ----
    n_rows = B * L
    x2d = x_seq_input.reshape(n_rows, D2)
    TM = min(512, _round_up(n_rows, 8))
    n_pad = _round_up(n_rows, TM)
    if n_pad != n_rows:
        x2d = jnp.pad(x2d, ((0, n_pad - n_rows), (0, 0)))
    NOUT = 128
    w_out_p = jnp.pad(params['w_out'], ((0, 0), (0, NOUT - 5))).astype(cdt)
    b_out_p = jnp.pad(params['b_out'], ((0, 0), (0, NOUT - 5)))

    out2d = pl.pallas_call(
        linear_kernel,
        out_shape=jax.ShapeDtypeStruct((n_pad, NOUT), jnp.float32),
        grid=(n_pad // TM,),
        in_specs=[pl.BlockSpec((TM, D2), lambda i: (i, 0)),
                  pl.BlockSpec((D2, NOUT), lambda i: (0, 0)),
                  pl.BlockSpec((1, NOUT), lambda i: (0, 0))],
        out_specs=pl.BlockSpec((TM, NOUT), lambda i: (i, 0)),
        compiler_params=pltpu.CompilerParams(dimension_semantics=("parallel",)),
    )(x2d, w_out_p, b_out_p)

    return out2d[:n_rows, :5].reshape(B, L, 5)


# ----------------------------------------------------------------------------
# Deterministic synthetic parameters (shapes follow the module __init__)
# ----------------------------------------------------------------------------
def init_params(key, c_in, si, vi, E, num_blocks):
    D2 = 2 * E
    keys = iter(jax.random.split(key, 64))

    def w(shape, scale=0.1):
        return (scale * jax.random.normal(next(keys), shape)).astype(jnp.float32)

    params = dict(
        # linear_in_seq
        w_seq=w((c_in, E)), b_seq=w((1, E)),
        # gvp.LayerNorm((si, vi)) scalar affine
        ln_g=jnp.ones((1, si), jnp.float32), ln_b=jnp.zeros((1, si), jnp.float32),
        # GVP((si, vi) -> (E, 0)): wh Linear(vi, vi, bias=False), ws Linear(si+vi, E)
        wh=w((vi, vi)), ws=w((si + vi, E)), bs=w((1, E)),
        # shared bottleneck MLP
        w1=w((D2, E)), b1=w((1, E)),
        w2=w((E, E // 2)), b2=w((1, E // 2)),
        w3=w((E // 2, E)), b3=w((1, E)),
        w4=w((E, D2)), b4=w((1, D2)),
        # linear_out
        w_out=w((D2, 5)), b_out=w((1, 5)),
        # per-block MultiheadAttention weights (embed_dim = 2E), (in, out) layout
        mha=[dict(wq=w((D2, D2)), bq=w((1, D2)),
                  wk=w((D2, D2)), bk=w((1, D2)),
                  wv=w((D2, D2)), bv=w((1, D2)),
                  wo=w((D2, D2)), bo=w((1, D2)))
             for _ in range(num_blocks)],
    )
    return params


if __name__ == "__main__":
    B, L = 2, 8
    c_in, si, vi, E = 16, 16, 4, 32        # node_h_dim = (si, vi), embed_dim = E
    num_heads, num_blocks = 8, 2

    key = jax.random.PRNGKey(0)
    k1, k2, k3, k4, kp = jax.random.split(key, 5)

    data = {
        'lm_representation': jax.random.normal(k1, (B, L, c_in), jnp.float32),
        'structure_encoding': jax.random.normal(k2, (B, L, si), jnp.float32),
        'structure_encoding_vector': jax.random.normal(k3, (B, L, vi, 3), jnp.float32),
        'positional_encoding': jax.random.normal(k4, (B, L, 2 * E), jnp.float32),
        'pad_mask': jnp.array([[False] * L,
                               [False] * (L - 2) + [True] * 2], dtype=bool),
        'need_attn_weights': False,   # only affects returned attn weights; no-op here
    }

    params = init_params(kp, c_in, si, vi, E, num_blocks)
    out = rna_inverse_folding_adapter_forward(
        data, params, num_heads=num_heads, num_blocks=num_blocks)
    jax.block_until_ready(out)
    assert out.shape == (B, L, 5) and bool(jnp.all(jnp.isfinite(out)))
    print("KERNEL_OK")
</pallas_src>

<mosaic_0001>
module attributes {stable_mosaic.version = 11 : i64} {
  func.func @encode_kernel(%arg0: i32, %arg1: memref<1x8x16xf32, #tpu.memory_space<vmem>>, %arg2: memref<1x8x16xf32, #tpu.memory_space<vmem>>, %arg3: memref<1x24x4xf32, #tpu.memory_space<vmem>>, %arg4: memref<1x8x64xf32, #tpu.memory_space<vmem>>, %arg5: memref<16x32xbf16, #tpu.memory_space<vmem>>, %arg6: memref<1x32xf32, #tpu.memory_space<vmem>>, %arg7: memref<1x16xf32, #tpu.memory_space<vmem>>, %arg8: memref<1x16xf32, #tpu.memory_space<vmem>>, %arg9: memref<4x4xbf16, #tpu.memory_space<vmem>>, %arg10: memref<20x32xbf16, #tpu.memory_space<vmem>>, %arg11: memref<1x32xf32, #tpu.memory_space<vmem>>, %arg12: memref<1x8x64xf32, #tpu.memory_space<vmem>>) attributes {dimension_semantics = [#tpu.dimension_semantics<parallel>], iteration_bounds = array<i64: 2>, scalar_prefetch = 0 : i64, scratch_operands = 0 : i64, tpu.core_type = #tpu.core_type<tc>, window_params = [{transform_indices = @transform_0, window_bounds = array<i64: 1, 8, 16>}, {transform_indices = @transform_1, window_bounds = array<i64: 1, 8, 16>}, {transform_indices = @transform_2, window_bounds = array<i64: 1, 24, 4>}, {transform_indices = @transform_3, window_bounds = array<i64: 1, 8, 64>}, {pipeline_mode = #tpu.pipeline_mode<synchronous>, transform_indices = @transform_4, window_bounds = array<i64: 16, 32>}, {pipeline_mode = #tpu.pipeline_mode<synchronous>, transform_indices = @transform_5, window_bounds = array<i64: 1, 32>}, {pipeline_mode = #tpu.pipeline_mode<synchronous>, transform_indices = @transform_6, window_bounds = array<i64: 1, 16>}, {pipeline_mode = #tpu.pipeline_mode<synchronous>, transform_indices = @transform_7, window_bounds = array<i64: 1, 16>}, {pipeline_mode = #tpu.pipeline_mode<synchronous>, transform_indices = @transform_8, window_bounds = array<i64: 4, 4>}, {pipeline_mode = #tpu.pipeline_mode<synchronous>, transform_indices = @transform_9, window_bounds = array<i64: 20, 32>}, {pipeline_mode = #tpu.pipeline_mode<synchronous>, transform_indices = @transform_10, window_bounds = array<i64: 1, 32>}, {transform_indices = @transform_11, window_bounds = array<i64: 1, 8, 64>}]} {
    %c0 = arith.constant 0 : index
    %c0_0 = arith.constant 0 : index
    %c0_1 = arith.constant 0 : index
    %0 = vector.load %arg1[%c0, %c0_0, %c0_1] : memref<1x8x16xf32, #tpu.memory_space<vmem>>, vector<1x8x16xf32>
    %1 = vector.shape_cast %0 : vector<1x8x16xf32> to vector<8x16xf32>
    %2 = arith.truncf %1 : vector<8x16xf32> to vector<8x16xbf16>
    %c0_2 = arith.constant 0 : index
    %c0_3 = arith.constant 0 : index
    %3 = vector.load %arg5[%c0_2, %c0_3] : memref<16x32xbf16, #tpu.memory_space<vmem>>, vector<16x32xbf16>
    %cst = arith.constant dense<0.000000e+00> : vector<8x32xf32>
    %4 = tpu.matmul %2, %3, %cst {dimension_numbers = #tpu.dot_dimension_numbers<[1], [0], [0], [1], [0, 0, 1, 1], [], []>} : vector<8x16xbf16>, vector<16x32xbf16>, vector<8x32xf32> -> vector<8x32xf32>
    %c0_4 = arith.constant 0 : index
    %c0_5 = arith.constant 0 : index
    %5 = vector.load %arg6[%c0_4, %c0_5] : memref<1x32xf32, #tpu.memory_space<vmem>>, vector<1x32xf32>
    %6 = vector.broadcast %5 : vector<1x32xf32> to vector<8x32xf32>
    %7 = arith.addf %4, %6 : vector<8x32xf32>
    %c0_6 = arith.constant 0 : index
    %c0_7 = arith.constant 0 : index
    %c0_8 = arith.constant 0 : index
    %8 = vector.load %arg2[%c0_6, %c0_7, %c0_8] : memref<1x8x16xf32, #tpu.memory_space<vmem>>, vector<1x8x16xf32>
    %9 = vector.shape_cast %8 : vector<1x8x16xf32> to vector<8x16xf32>
    %cst_9 = arith.constant dense<0.000000e+00> : vector<8xf32>
    %10 = vector.multi_reduction <add>, %9, %cst_9 [1] : vector<8x16xf32> to vector<8xf32>
    %11 = vector.shape_cast %10 : vector<8xf32> to vector<8x1xf32>
    %cst_10 = arith.constant 1.600000e+01 : f32
    %12 = vector.broadcast %cst_10 : f32 to vector<8x1xf32>
    %13 = arith.divf %11, %12 : vector<8x1xf32>
    %14 = vector.broadcast %13 : vector<8x1xf32> to vector<8x16xf32>
    %15 = arith.subf %9, %14 : vector<8x16xf32>
    %16 = arith.mulf %15, %15 : vector<8x16xf32>
    %cst_11 = arith.constant dense<0.000000e+00> : vector<8xf32>
    %17 = vector.multi_reduction <add>, %16, %cst_11 [1] : vector<8x16xf32> to vector<8xf32>
    %18 = vector.shape_cast %17 : vector<8xf32> to vector<8x1xf32>
    %cst_12 = arith.constant 1.600000e+01 : f32
    %19 = vector.broadcast %cst_12 : f32 to vector<8x1xf32>
    %20 = arith.divf %18, %19 : vector<8x1xf32>
    %21 = vector.broadcast %13 : vector<8x1xf32> to vector<8x16xf32>
    %22 = arith.subf %9, %21 : vector<8x16xf32>
    %cst_13 = arith.constant 9.99999974E-6 : f32
    %23 = vector.broadcast %cst_13 : f32 to vector<8x1xf32>
    %24 = arith.addf %20, %23 : vector<8x1xf32>
    %25 = math.rsqrt %24 : vector<8x1xf32>
    %26 = vector.broadcast %25 : vector<8x1xf32> to vector<8x16xf32>
    %27 = arith.mulf %22, %26 : vector<8x16xf32>
    %c0_14 = arith.constant 0 : index
    %c0_15 = arith.constant 0 : index
    %28 = vector.load %arg7[%c0_14, %c0_15] : memref<1x16xf32, #tpu.memory_space<vmem>>, vector<1x16xf32>
    %29 = vector.broadcast %28 : vector<1x16xf32> to vector<8x16xf32>
    %30 = arith.mulf %27, %29 : vector<8x16xf32>
    %c0_16 = arith.constant 0 : index
    %c0_17 = arith.constant 0 : index
    %31 = vector.load %arg8[%c0_16, %c0_17] : memref<1x16xf32, #tpu.memory_space<vmem>>, vector<1x16xf32>
    %32 = vector.broadcast %31 : vector<1x16xf32> to vector<8x16xf32>
    %33 = arith.addf %30, %32 : vector<8x16xf32>
    %c0_18 = arith.constant 0 : index
    %c0_19 = arith.constant 0 : index
    %c0_20 = arith.constant 0 : index
    %34 = vector.load %arg3[%c0_18, %c0_19, %c0_20] : memref<1x24x4xf32, #tpu.memory_space<vmem>>, vector<1x24x4xf32>
    %35 = vector.shape_cast %34 : vector<1x24x4xf32> to vector<24x4xf32>
    %36 = arith.truncf %35 : vector<24x4xf32> to vector<24x4xbf16>
    %c0_21 = arith.constant 0 : index
    %c0_22 = arith.constant 0 : index
    %37 = vector.load %arg9[%c0_21, %c0_22] : memref<4x4xbf16, #tpu.memory_space<vmem>>, vector<4x4xbf16>
    %cst_23 = arith.constant dense<0.000000e+00> : vector<24x4xf32>
    %38 = tpu.matmul %36, %37, %cst_23 {dimension_numbers = #tpu.dot_dimension_numbers<[1], [0], [0], [1], [0, 0, 1, 1], [], []>} : vector<24x4xbf16>, vector<4x4xbf16>, vector<24x4xf32> -> vector<24x4xf32>
    %39 = vector.extract_strided_slice %35 {offsets = [0, 0], sizes = [8, 4], strides = [1, 1]} : vector<24x4xf32> to vector<8x4xf32>
    %40 = vector.extract_strided_slice %35 {offsets = [8, 0], sizes = [8, 4], strides = [1, 1]} : vector<24x4xf32> to vector<8x4xf32>
    %41 = vector.extract_strided_slice %35 {offsets = [16, 0], sizes = [8, 4], strides = [1, 1]} : vector<24x4xf32> to vector<8x4xf32>
    %42 = vector.extract_strided_slice %38 {offsets = [0, 0], sizes = [8, 4], strides = [1, 1]} : vector<24x4xf32> to vector<8x4xf32>
    %43 = vector.extract_strided_slice %38 {offsets = [8, 0], sizes = [8, 4], strides = [1, 1]} : vector<24x4xf32> to vector<8x4xf32>
    %44 = vector.extract_strided_slice %38 {offsets = [16, 0], sizes = [8, 4], strides = [1, 1]} : vector<24x4xf32> to vector<8x4xf32>
    %45 = arith.mulf %39, %39 : vector<8x4xf32>
    %46 = arith.mulf %40, %40 : vector<8x4xf32>
    %47 = arith.addf %45, %46 : vector<8x4xf32>
    %48 = arith.mulf %41, %41 : vector<8x4xf32>
    %49 = arith.addf %47, %48 : vector<8x4xf32>
    %cst_24 = arith.constant 9.99999993E-9 : f32
    %50 = vector.broadcast %cst_24 : f32 to vector<8x4xf32>
    %51 = arith.maximumf %49, %50 : vector<8x4xf32>
    %cst_25 = arith.constant dense<0.000000e+00> : vector<8xf32>
    %52 = vector.multi_reduction <add>, %51, %cst_25 [1] : vector<8x4xf32> to vector<8xf32>
    %53 = vector.shape_cast %52 : vector<8xf32> to vector<8x1xf32>
    %cst_26 = arith.constant 4.000000e+00 : f32
    %54 = vector.broadcast %cst_26 : f32 to vector<8x1xf32>
    %55 = arith.divf %53, %54 : vector<8x1xf32>
    %cst_27 = arith.constant 1.000000e+00 : f32
    %56 = vector.broadcast %cst_27 : f32 to vector<8x1xf32>
    %57 = arith.divf %56, %55 : vector<8x1xf32>
    %58 = arith.mulf %42, %42 : vector<8x4xf32>
    %59 = arith.mulf %43, %43 : vector<8x4xf32>
    %60 = arith.addf %58, %59 : vector<8x4xf32>
    %61 = arith.mulf %44, %44 : vector<8x4xf32>
    %62 = arith.addf %60, %61 : vector<8x4xf32>
    %63 = vector.broadcast %57 : vector<8x1xf32> to vector<8x4xf32>
    %64 = arith.mulf %63, %62 : vector<8x4xf32>
    %cst_28 = arith.constant 9.99999993E-9 : f32
    %65 = vector.broadcast %cst_28 : f32 to vector<8x4xf32>
    %66 = arith.maximumf %64, %65 : vector<8x4xf32>
    %67 = math.sqrt %66 : vector<8x4xf32>
    %68 = tpu.concatenate %33, %67 in 1 : vector<8x16xf32>, vector<8x4xf32> -> vector<8x20xf32>
    %69 = arith.truncf %68 : vector<8x20xf32> to vector<8x20xbf16>
    %c0_29 = arith.constant 0 : index
    %c0_30 = arith.constant 0 : index
    %70 = vector.load %arg10[%c0_29, %c0_30] : memref<20x32xbf16, #tpu.memory_space<vmem>>, vector<20x32xbf16>
    %cst_31 = arith.constant dense<0.000000e+00> : vector<8x32xf32>
    %71 = tpu.matmul %69, %70, %cst_31 {dimension_numbers = #tpu.dot_dimension_numbers<[1], [0], [0], [1], [0, 0, 1, 1], [], []>} : vector<8x20xbf16>, vector<20x32xbf16>, vector<8x32xf32> -> vector<8x32xf32>
    %c0_32 = arith.constant 0 : index
    %c0_33 = arith.constant 0 : index
    %72 = vector.load %arg11[%c0_32, %c0_33] : memref<1x32xf32, #tpu.memory_space<vmem>>, vector<1x32xf32>
    %73 = vector.broadcast %72 : vector<1x32xf32> to vector<8x32xf32>
    %74 = arith.addf %71, %73 : vector<8x32xf32>
    %c2_i32 = arith.constant 2 : i32
    %75 = tpu.dynamic_rotate %74 by %c2_i32 dim 0 : vector<8x32xf32>, i32 -> vector<8x32xf32>
    %76 = tpu.concatenate %7, %75 in 1 : vector<8x32xf32>, vector<8x32xf32> -> vector<8x64xf32>
    %c0_34 = arith.constant 0 : index
    %c0_35 = arith.constant 0 : index
    %c0_36 = arith.constant 0 : index
    %77 = vector.load %arg4[%c0_34, %c0_35, %c0_36] : memref<1x8x64xf32, #tpu.memory_space<vmem>>, vector<1x8x64xf32>
    %78 = vector.shape_cast %77 : vector<1x8x64xf32> to vector<8x64xf32>
    %79 = arith.addf %76, %78 : vector<8x64xf32>
    %c0_37 = arith.constant 0 : index
    %c0_38 = arith.constant 0 : index
    %c0_39 = arith.constant 0 : index
    %80 = vector.load %arg12[%c0_37, %c0_38, %c0_39] : memref<1x8x64xf32, #tpu.memory_space<vmem>>, vector<1x8x64xf32>
    %81 = vector.shape_cast %80 : vector<1x8x64xf32> to vector<8x64xf32>
    %82 = vector.shape_cast %79 : vector<8x64xf32> to vector<1x8x64xf32>
    tpu.vector_store %arg12[%c0_37, %c0_38, %c0_39], %82 {strides = array<i32>} : memref<1x8x64xf32, #tpu.memory_space<vmem>>, vector<1x8x64xf32>,
    return
  }
  func.func @transform_0(%arg0: i32) -> (i32, i32, i32) {
    %c0_i32 = arith.constant 0 : i32
    %c0_i32_0 = arith.constant 0 : i32
    %c0_i32_1 = arith.constant 0 : i32
    return %arg0, %c0_i32, %c0_i32_0 : i32, i32, i32
  }
  func.func @transform_1(%arg0: i32) -> (i32, i32, i32) {
    %c0_i32 = arith.constant 0 : i32
    %c0_i32_0 = arith.constant 0 : i32
    %c0_i32_1 = arith.constant 0 : i32
    return %arg0, %c0_i32, %c0_i32_0 : i32, i32, i32
  }
  func.func @transform_2(%arg0: i32) -> (i32, i32, i32) {
    %c0_i32 = arith.constant 0 : i32
    %c0_i32_0 = arith.constant 0 : i32
    %c0_i32_1 = arith.constant 0 : i32
    return %arg0, %c0_i32, %c0_i32_0 : i32, i32, i32
  }
  func.func @transform_3(%arg0: i32) -> (i32, i32, i32) {
    %c0_i32 = arith.constant 0 : i32
    %c0_i32_0 = arith.constant 0 : i32
    %c0_i32_1 = arith.constant 0 : i32
    return %arg0, %c0_i32, %c0_i32_0 : i32, i32, i32
  }
  func.func @transform_4(%arg0: i32) -> (i32, i32) {
    %c0_i32 = arith.constant 0 : i32
    %c0_i32_0 = arith.constant 0 : i32
    %c0_i32_1 = arith.constant 0 : i32
    return %c0_i32, %c0_i32_0 : i32, i32
  }
  func.func @transform_5(%arg0: i32) -> (i32, i32) {
    %c0_i32 = arith.constant 0 : i32
    %c0_i32_0 = arith.constant 0 : i32
    %c0_i32_1 = arith.constant 0 : i32
    return %c0_i32, %c0_i32_0 : i32, i32
  }
  func.func @transform_6(%arg0: i32) -> (i32, i32) {
    %c0_i32 = arith.constant 0 : i32
    %c0_i32_0 = arith.constant 0 : i32
    %c0_i32_1 = arith.constant 0 : i32
    return %c0_i32, %c0_i32_0 : i32, i32
  }
  func.func @transform_7(%arg0: i32) -> (i32, i32) {
    %c0_i32 = arith.constant 0 : i32
    %c0_i32_0 = arith.constant 0 : i32
    %c0_i32_1 = arith.constant 0 : i32
    return %c0_i32, %c0_i32_0 : i32, i32
  }
  func.func @transform_8(%arg0: i32) -> (i32, i32) {
    %c0_i32 = arith.constant 0 : i32
    %c0_i32_0 = arith.constant 0 : i32
    %c0_i32_1 = arith.constant 0 : i32
    return %c0_i32, %c0_i32_0 : i32, i32
  }
  func.func @transform_9(%arg0: i32) -> (i32, i32) {
    %c0_i32 = arith.constant 0 : i32
    %c0_i32_0 = arith.constant 0 : i32
    %c0_i32_1 = arith.constant 0 : i32
    return %c0_i32, %c0_i32_0 : i32, i32
  }
  func.func @transform_10(%arg0: i32) -> (i32, i32) {
    %c0_i32 = arith.constant 0 : i32
    %c0_i32_0 = arith.constant 0 : i32
    %c0_i32_1 = arith.constant 0 : i32
    return %c0_i32, %c0_i32_0 : i32, i32
  }
  func.func @transform_11(%arg0: i32) -> (i32, i32, i32) {
    %c0_i32 = arith.constant 0 : i32
    %c0_i32_0 = arith.constant 0 : i32
    %c0_i32_1 = arith.constant 0 : i32
    return %arg0, %c0_i32, %c0_i32_0 : i32, i32, i32
  }
}

</mosaic_0001>

<bundles_post_ra>
// kernel: tpu_custom_call.1
= control target key start
LH: loop header
LB: loop body
LE: loop exit
PB: predicated region body
PF: predicated region fallthrough
CT: control target
= control target key end

     0   :  { %s1193_s0 = inlined_call_operand.vmem [shape: f32[2,8,16], index: 0, kind: input, shape index: {}]   ;;  %s1194_s1 = inlined_call_operand.vmem [shape: f32[2,8,16], index: 1, kind: input, shape index: {}]   ;;  %s1195_s2 = inlined_call_operand.vmem [shape: f32[2,24,4], index: 2, kind: input, shape index: {}]   ;;  %s1196_s3 = inlined_call_operand.vmem [shape: f32[2,8,64], index: 3, kind: input, shape index: {}]   ;;  %s1197_s4 = inlined_call_operand.vmem [shape: bf16[16,32], index: 4, kind: input, shape index: {}]   ;;  %s1198_s5 = inlined_call_operand.vmem [shape: f32[1,32], index: 5, kind: input, shape index: {}]   ;;  %s1199_s6 = inlined_call_operand.vmem [shape: f32[1,16], index: 6, kind: input, shape index: {}]   ;;  %s1200_s7 = inlined_call_operand.vmem [shape: f32[1,16], index: 7, kind: input, shape index: {}]   ;;  %s1201_s8 = inlined_call_operand.vmem [shape: bf16[4,4], index: 8, kind: input, shape index: {}]   ;;  %s1202_s9 = inlined_call_operand.vmem [shape: bf16[20,32], index: 9, kind: input, shape index: {}]   ;;  %s1203_s10 = inlined_call_operand.vmem [shape: f32[1,32], index: 10, kind: input, shape index: {}]   ;;  %s1204_s11 = inlined_call_operand.hbm [shape: f32[2,8,64], index: 11, kind: output, shape index: {}]  }
   0x1   :  { %1205 = sst [smem:[#allocation5_spill]] %s1193_s0 }
   0x2   :  { %1206 = sst [smem:[#allocation6_spill]] %s1194_s1 }
   0x3   :  { %1207 = sst [smem:[#allocation7_spill]] %s1195_s2 }
   0x4   :  { %16 = vsyncpa [#allocation3], 0 }
   0x5   :  { %18 = vsyncpa [#allocation3 + $0x1], 0  ;;  %s1048_s17 = smov 0   ;;  %s1050_s18 = smov 0  }
   0x6   :  { %s1052_s19 = smov 0   ;;  %s1054_s20 = smov 0  }
   0x7 LB: > { %s1069_s21 = sadd.s32 4294967295, %s981_s20   ;;  %s813_s22 = sadd.s32 4294967294, %s981_s20   ;;  %s981_s20 = sphi %s1054_s20, %s1216_s20   ;;  %s977_s19 = sphi %s1052_s19, %s1215_s19   ;;  %s973_s18 = sphi %s1050_s18, %s1214_s18   ;;  %s969_s17 = sphi %s1048_s17, %s1213_s17  }
   0x8   : > { %s1073_s23 = sadd.s32 1, %s981_s20   ;;  %s282_s24 = sadd.s32 1, %s977_s19 }
   0x9   : > { %s279_s25 = ssub.s32 %s981_s20, %s1073_s23  ;;  %p292_p0 = scmp.ne.s32.totalorder %s977_s19, %s973_s18 }
   0xa   : > { %p280_p1 = scmp.eq.s32.totalorder %s279_s25, 0  ;;  %p293_p2 = scmp.eq.s32.totalorder %s1069_s21, 1 }
   0xb   : > { %p298_p3 = scmp.ne.s32.totalorder %s973_s18, %s969_s17  ;;  %p299_p4 = scmp.eq.s32.totalorder %s813_s22, 1 }
   0xc   : > { %s1084_s26 = scalar_select %p280_p1, %s977_s19, %s282_s24  }
   0xd   : > { %p1086_p5 = por %p293_p2, %p292_p0  ;;  %p1090_p6 = por %p299_p4, %p298_p3 }
   0xe   : > { %p816_p7 = scmp.ge.s32.totalorder %s981_s20, 1  ;;  %p367_p8 = scmp.lt.s32.totalorder %s981_s20, 3 }
  0x10   : > { %p368_p9 = pnand %p816_p7, %p367_p8 }
  0x11   : > { %v534_v0 = vld [vmem:[%s1201_s8] sm:$0x3] (!%p368_p9)  ;;  %vm542_vm0 = vcmask (!%p368_p9), 1041408   ;;  %p419_p10 = scmp.lt.s32.totalorder (!%p368_p9), %s1069_s21, 1  ;;  %vm454_vm1 = vcmask (!%p368_p9), 130048   ;;  %s1210_s1 = sld [smem:[#allocation6_spill]] (!%p368_p9) }
  0x12   : > { %371 = sbr.rel (%p368_p9) target bundleno = 740 (0x2e4), region = 64  ;;  %865 = vmatprep.subr.msk.bf16.mxu1 (!%p368_p9), %vm542_vm0, %v534_v0  ;;  %v544_v1 = vsel (!%p368_p9), %vm542_vm0, %v534_v0, 0  ;;  %s1211_s2 = sld [smem:[#allocation7_spill]] (!%p368_p9)  ;;  %vm535_vm2 = vcmask (!%p368_p9), 31744   ;;  %v910_v22 = vld [vmem:[%s1197_s4] sm:$0xff] (!%p368_p9)   ;;  %v983_v24 = vmov (!%p368_p9), 0.0  }
  0x13   : > { %852 = vmatpush3.bf16.msra.mxu1 (!%p368_p9), %v544_v1  ;;  %s1212_s0 = sld [smem:[#allocation5_spill]] (!%p368_p9)  ;;  %845 = vmatprep.subr.bf16.mxu0 (!%p368_p9), %v983_v24  ;;  %vm984_vm3 = vmmov (!%p368_p9), 0   ;;  %v911_v25 = vld [vmem:[%s1202_s9] sm:$0xff] (!%p368_p9)   ;;  %v912_v40 = vld [vmem:[%s1202_s9 + $0x8] ss:$0 sps:$4 sm:$0x33] (!%p368_p9)  }
  0x14   : > { %847 = vmatprep.mubr.msk.bf16.mxu0 (!%p368_p9), %vm984_vm3, %v983_v24  ;;  %846 = vmatpush3.bf16.msra.mxu0 (!%p368_p9), %v910_v22  ;;  %v651_v41 = vsel (!%p368_p9), %vm542_vm0, %v912_v40, 0  ;;  %s985_s30 = smov (!%p368_p9), 16   ;;  %v825_v52 = vld [vmem:[%s1199_s6] ss:$0 sm:$0xff] (!%p368_p9)  ;;  %vm646_vm6 = vcmask (!%p368_p9), 162816   ;;  %s986_s25 = smov (!%p368_p9), 32  }
  0x15   : > { %857 = vmatprep.subr.bf16.mxu0 (!%p368_p9), %v983_v24  ;;  %v826_v54 = vld [vmem:[%s1200_s7] ss:$0 sm:$0xff] (!%p368_p9)  ;;  %vm698_vm7 = vcmask (!%p368_p9), 261120   ;;  %s834_s24 = sshll.u32 (!%p368_p9), %s1069_s21, 7  ;;  %vm702_vm8 = vcmask (!%p368_p9), 523264  }
  0x16   : > { %v829_v63 = vld [vmem:[%s1203_s10] ss:$0 sm:$0xff] (!%p368_p9) }
  0x19   : > { %s420_s12 = scalar_select %p419_p10, %s1069_s21, 1 }
  0x1a   : > { %s987_s21 = smov [#allocation2]  }
  0x1b   : > { %s1103_s13 = sshll.u32 %s420_s12, 3  ;;  %s866_s14 = smul.u32 24, %s420_s12 }
  0x1c   : > { %s426_s22 = scalar_lea.vmem %s1210_s1, %s1103_s13  ;;  %s1151_s12 = scalar_lea.hbm %s1204_s11, %s834_s24 }
  0x1d   : > { %v498_v2 = vld [vmem:[%s426_s22] sm:$0xff]  ;;  %s431_s29 = scalar_lea.vmem %s1211_s2, %s866_s14  ;;  %s422_s14 = scalar_lea.vmem %s1212_s0, %s1103_s13 }
  0x1e   : > { %v499_v3 = vsel %vm454_vm1, %v498_v2, 0.0  ;;  %v529_v4 = vld [vmem:[%s431_s29] sm:$0xff]  ;;  %v530_v5 = vld [vmem:[%s431_s29 + $0x8] sm:$0xff]  ;;  %v531_v6 = vld [vmem:[%s431_s29 + $0x10] sm:$0xff]  ;;  %s416_s29 = sand.u32 1, %s973_s18   ;;  %s435_s22 = scalar_lea.vmem %s1196_s3, %s1103_s13 }
  0x1f   : > { %500 = vadd.xlane.f32.xlu0 %v499_v3  ;;  %v532_v7 = vpack.c.bf16 %v530_v5, %v529_v4  ;;  %v594_v8 = vmul.f32 %v529_v4, %v529_v4  ;;  %v595_v9 = vmul.f32 %v530_v5, %v530_v5  ;;  %v533_v10 = vpack.c.bf16 %v531_v6, %v531_v6  ;;  %v437_v21 = vld [vmem:[%s422_s14] sm:$0xff]  ;;  %s705_s13 = scalar_lea.sflag [#allocation3], %s416_s29 }
  0x20   : > { %v597_v11 = vmul.f32 %v531_v6, %v531_v6  ;;  %v438_v23 = vpack.c.bf16 %v437_v21, %v437_v21  ;;  %v822_v6 = vld [vmem:[%s1198_s5] ss:$0 sm:$0xff] }
  0x21   : > { %853 = vmatprep.mubr.msk.bf16.mxu1 %vm535_vm2, %v532_v7  ;;  %v596_v12 = vadd.f32 %v595_v9, %v594_v8  ;;  %v700_v8 = vld [vmem:[%s435_s22] sm:$0xff] }
  0x22   : > { %854 = vmatmul.mubr.msk.bf16.vlgmr.msra.gmra.mrb[0].mxu1 %vm535_vm2, %v533_v10  ;;  %848 = vmatmul.mubr.msk.bf16.vlgmr.msra.gmra.mrb[0].mxu0 %vm454_vm1, %v438_v23 }
  0x23   : > { %v598_v13 = vadd.f32 %v597_v11, %v596_v12  ;;  %858 = vmatpush3.bf16.msra.mxu0 %v911_v25  ;;  %861 = vmatprep.mubr.msk.bf16.mxu0 %vm984_vm3, %v983_v24 }
  0x24   : > { %859 = vmatprep.subr.bf16.mxu0 %v983_v24 }
  0x25   : > { %v599_v14 = vmax.f32 %v598_v13, 1e-08 }
  0x27   : > { %v600_v15 = vsel %vm535_vm2, %v599_v14, 0.0  ;;  %860 = vmatpush3.bf16.msra.mxu0 %v651_v41 }
  0x28   : > { %601 = vadd.xlane.f32.xlu0 %v600_v15 }
  0xac   : > { %v501_v16 = vpop.xlane.xlu0 %500 }
  0xad   : > { %v503_v17 = vmul.f32 0.0625, %v501_v16 }
  0xaf   : > { %v504_v18 = vsub.f32 %v498_v2, %v503_v17 }
  0xb1   : > { %v505_v19 = vmul.f32 %v504_v18, %v504_v18 }
  0xb3   : > { %v506_v20 = vsel %vm454_vm1, %v505_v19, 0.0 }
  0xb4   : > { %507 = vadd.xlane.f32.xlu1 %v506_v20 }
  0xb5   : > { %v602_v26 = vpop.xlane.xlu0 %601 }
  0xb6   : > { %v604_v27 = vmul.f32 0.25, %v602_v26 }
  0xb8   : > { %913 = vrcp.f32 %v604_v27 }
  0xc2   : > { %v914_v36 = vpop.eup %913 }
  0xf5   : > { %v855_v28 = vpop.f32.mrb[0].mxu1  ;;  %v492_v59 = vpop.f32.mrb[0].mxu0 }
  0xf6   : > { %v580_v29 = vpop.f32.mrb[1].mxu1  ;;  %v610_v34 = vmul.f32 %v855_v28, %v855_v28  ;;  %v849_v60 = vpop.f32.mrb[1].mxu0  ;;  %v493_v7 = vadd.f32 %v822_v6, %v492_v59 }
  0xf7   : > { %v856_v30 = vpop.f32.mrb[2].mxu1  ;;  %v607_v32 = vmul.f32 %v580_v29, %v580_v29  ;;  %v495_v61 = vpop.f32.mrb[2].mxu0 }
  0xf8   : > { %v583_v31 = vpop.f32.mrb[3].mxu1  ;;  %v850_v62 = vpop.f32.mrb[3].mxu0 }
  0xf9   : > { %v608_v33 = vmul.f32 %v583_v31, %v583_v31 }
  0xfb   : > { %v609_v35 = vadd.f32 %v608_v33, %v607_v32 }
  0xfd   : > { %v611_v37 = vadd.f32 %v610_v34, %v609_v35 }
  0xff   : > { %v612_v38 = vmul.f32 %v914_v36, %v611_v37 }
 0x101   : > { %v613_v39 = vmax.f32 %v612_v38, 1e-08 }
 0x103   : > { %915 = vrsqrt.f32 %v613_v39  ;;  %vm616_vm4 = vcmp.eq.f32.partialorder %v613_v39, inf  ;;  %v619_v44 = vand.u32 2147483648, %v613_v39  ;;  %vm618_vm5 = vcmp.eq.f32.partialorder %v613_v39, 0.0 }
 0x10d   : > { %v916_v42 = vpop.eup %915 }
 0x10e   : > { %v615_v43 = vmul.f32 %v916_v42, %v613_v39 }
 0x110   : > { %v617_v45 = vsel %vm616_vm4, %v613_v39, %v615_v43 }
 0x111   : > { %v620_v46 = vsel %vm618_vm5, %v619_v44, %v617_v45 }
 0x112   : > { %622 = vrot.lane.b32.xlu1 %v620_v46, %s985_s30  ;;  %s817_s30 = sshll.u32 %s416_s29, 3 }
 0x113   : > { %s418_s0 = scalar_lea.vmem [#allocation2], %s817_s30  ;;  %s923_s30 = sshll.u32 %s987_s21, 4  ;;  %s924_s30 = int_to_ptr.vmem [resolvable:$false] %s923_s30 }
 0x114   : > { %s718_s1 = sshll.u32 %s418_s0, 4  ;;  %s925_s15 = scalar_lea.vmem %s924_s30, 256  ;;  %s1153_s1 = int_to_ptr.vmem [resolvable:$true] %s718_s1 }
 0x115   : > { %s919_s14 = scalar_lea.vmem %s1153_s1, 128  ;;  %p926_p0 = scmp.lt.s32.totalorder %s1153_s1, %s924_s30 }
 0x116   : > { %p920_p11 = scmp.ne.s32.totalorder %s1153_s1, %s919_s14  ;;  %p927_p1 = scmp.lt.s32.totalorder %s925_s15, %s919_s14 }
 0x118   : > { %p921_p12 = pnand %p920_p11, %p1086_p5  ;;  %p928_p2 = por %p927_p1, %p926_p0 }
 0x11a   : > { %p922_p13 = pneg %p921_p12 }
 0x11c   : > { %p929_p3 = pnand %p928_p2, %p922_p13 }
 0x141   : > { %v508_v47 = vpop.xlane.xlu1 %507 }
 0x142   : > { %v509_v48 = vmul.f32 0.0625, %v508_v47 }
 0x144   : > { %v510_v49 = vadd.f32 1e-05, %v509_v48 }
 0x146   : > { %917 = vrsqrt.f32 %v510_v49 }
 0x150   : > { %v918_v50 = vpop.eup %917 }
 0x151   : > { %v512_v51 = vmul.f32 %v918_v50, %v504_v18 }
 0x153   : > { %v520_v53 = vmul.f32 %v825_v52, %v512_v51 }
 0x155   : > { %v528_v55 = vadd.f32 %v826_v54, %v520_v53 }
 0x184   : > { %v623_v56 = vpop.permute.xlu1 %622 }
 0x185   : > { %v625_v57 = vsel %vm454_vm1, %v528_v55, %v623_v56 }
 0x186   : > { %v626_v58 = vpack.c.bf16 %v625_v57, %v625_v57 }
 0x188   : > { %862 = vmatmul.mubr.msk.bf16.vlgmr.msra.gmra.mrb[4].mxu0 %vm646_vm6, %v626_v58 }
 0x25b   : > { %v687_v0 = vpop.f32.mrb[4].mxu0 }
 0x25c   : > { %v688_v1 = vadd.f32 %v829_v63, %v687_v0  ;;  %v863_v2 = vpop.f32.mrb[5].mxu0 }
 0x25d   : > { %v690_v3 = vpop.f32.mrb[6].mxu0 }
 0x25e   : > { %v693_v4 = vrot.slane %v688_v1, 6  ;;  %v864_v5 = vpop.f32.mrb[7].mxu0 }
 0x260   : > { %695 = vrot.lane.b32.xlu0 %v693_v4, %s986_s25 }
 0x2d2   : > { %v696_v9 = vpop.permute.xlu0 %695 }
 0x2d3   : > { %v699_v10 = vsel %vm698_vm7, %v493_v7, %v696_v9 }
 0x2d4   : > { %v701_v11 = vadd.f32 %v700_v8, %v699_v10 }
 0x2d6   : > { %703 = vst.msk [vmem:[%s418_s0] sm:$0xff] %vm702_vm8, %v701_v11 }
 0x2d7   : > { %932 = shalt.err (!%p929_p3)
}
 0x2d8   : > { %s933_s0 = scalar_lea.hbm %s1151_s12, 128  ;;  %s937_s16 = scalar_lea.hbm %s1204_s11, 256 }
 0x2d9   : > { %p934_p4 = scmp.ne.s32.totalorder %s1151_s12, %s933_s0  ;;  %p938_p9 = scmp.lt.u32.totalorder %s1151_s12, %s1204_s11 }
 0x2da   : > { %p939_p10 = scmp.lt.u32.totalorder %s937_s16, %s933_s0  ;;  %p941_p12 = scmp.lt.u32.totalorder %s933_s0, %s1151_s12 }
 0x2db   : > { %p935_p7 = pnand %p934_p4, %p1086_p5 }
 0x2dc   : > { %p940_p11 = por %p939_p10, %p938_p9 }
 0x2dd   : > { %p936_p8 = pneg %p935_p7 }
 0x2de   : > { %p942_p13 = por %p941_p12, %p940_p11 }
 0x2e0   : > { %p943_p0 = pnand %p942_p13, %p936_p8 }
 0x2e2   : > { %946 = shalt.err (!%p943_p0)
}
 0x2e3   : > { %867 = dma.vmem_to_hbm [thread:$0]  (%p1086_p5), %s1153_s1, 128, %s1151_s12, %s705_s13  }
 0x2e4 PF: > { %p873_p1 = scmp.ge.s32.totalorder %s981_s20, 2  ;;  %s730_s25 = sand.u32 1, %s969_s17  }
 0x2e5   : > { %s731_s14 = scalar_lea.sflag [#allocation3], %s730_s25 }
 0x2e6   : > { %p870_p2 = pnand %p873_p1, %p1090_p6 }
 0x2e8   : > { %964 = dma.done.wait (!%p870_p2), %s731_s14, 128  }
 0x2e9   : > { %966 = vsyncadd (!%p870_p2), %s731_s14, 4294967168  ;;  %p21_p3 = scmp.ge.s32.totalorder %s1073_s23, 4   ;;  %s1213_s17 = smov %s973_s18 }
 0x2ea   : > { %s1214_s18 = smov %s977_s19  ;;  %s1215_s19 = smov %s1084_s26 }
 0x2eb   : > { %s1216_s20 = smov %s1073_s23  ;;  %23 = sbr.rel (!%p21_p3) target bundleno = 7 (0x7), region = 108 }
 0x2f2   :  { %736 = vsyncpa [#allocation3], 1 }
 0x2f3   :  { %738 = vsyncpa [#allocation3 + $0x1], 1 }

</bundles_post_ra>
